<compile_context>
chip_gen: v6e
topology: v6e:2x2x1
jax: 0.10.0
libtpu: 0.0.40
codegen_flags: <defaults>
</compile_context>

<pallas_src>
import jax
import jax.numpy as jnp
from jax.experimental import pallas as pl
from jax.experimental.pallas import tpu as pltpu


def _round_up(n: int, m: int) -> int:
    return ((n + m - 1) // m) * m


# ----------------------------------------------------------------------------
# Pallas kernel: one batch tile of the 3-layer MLP.
#   inputs x/w1/w2/w3 are bf16; all accumulation, bias-add and ReLU are f32.
# ----------------------------------------------------------------------------
def mlp_kernel(x_ref, w1_ref, b1_ref, w2_ref, b2_ref, w3_ref, b3_ref, o_ref):
    x = x_ref[...]                                                     # (TB, n_ch) bf16
    h1 = jnp.dot(x, w1_ref[...], preferred_element_type=jnp.float32)   # f32 accum
    h1 = jnp.maximum(h1 + b1_ref[...], 0.0)                            # (TB, 128) f32
    h2 = jnp.dot(h1.astype(jnp.bfloat16), w2_ref[...],
                 preferred_element_type=jnp.float32)
    h2 = jnp.maximum(h2 + b2_ref[...], 0.0)                            # (TB, 128) f32
    h3 = jnp.dot(h2.astype(jnp.bfloat16), w3_ref[...],
                 preferred_element_type=jnp.float32)
    h3 = jnp.maximum(h3 + b3_ref[...], 0.0)                            # (TB, n_ch) f32
    o_ref[...] = h3.astype(o_ref.dtype)


def mlp_pallas(x_flat, params, *, tile_b=256):
    """x_flat: (B, n_ch) f32. Weights pre-transposed to (in, out)."""
    B, n_ch = x_flat.shape

    # Pad rows to a multiple of 8 sublanes; cap the tile at the padded batch,
    # then pad the batch to a whole number of tiles (zero rows; sliced off).
    b_pad = _round_up(max(B, 8), 8)
    tb = min(_round_up(tile_b, 8), b_pad)
    b_pad = _round_up(b_pad, tb)
    if b_pad != B:
        x_flat = jnp.pad(x_flat, ((0, b_pad - B), (0, 0)))

    # bf16 at the boundary; f32 math inside.
    x16 = x_flat.astype(jnp.bfloat16)
    w1 = params["w1"].astype(jnp.bfloat16)
    w2 = params["w2"].astype(jnp.bfloat16)
    w3 = params["w3"].astype(jnp.bfloat16)
    b1, b2, b3 = params["b1"], params["b2"], params["b3"]

    grid = (b_pad // tb,)

    flops = 2 * b_pad * (n_ch * 128 + 128 * 128 + 128 * n_ch)
    bytes_accessed = (
        x16.size * 2 + b_pad * n_ch * 4                 # x in, out out
        + (w1.size + w2.size + w3.size) * 2             # bf16 weights
        + (b1.size + b2.size + b3.size) * 4             # f32 biases
    )

    out = pl.pallas_call(
        mlp_kernel,
        out_shape=jax.ShapeDtypeStruct((b_pad, n_ch), jnp.float32),
        grid=grid,
        in_specs=[
            pl.BlockSpec((tb, n_ch), lambda i: (i, 0)),     # x tile (pipelined)
            pl.BlockSpec((n_ch, 128), lambda i: (0, 0)),    # w1 (resident)
            pl.BlockSpec((1, 128), lambda i: (0, 0)),       # b1
            pl.BlockSpec((128, 128), lambda i: (0, 0)),     # w2
            pl.BlockSpec((1, 128), lambda i: (0, 0)),       # b2
            pl.BlockSpec((128, n_ch), lambda i: (0, 0)),    # w3
            pl.BlockSpec((1, n_ch), lambda i: (0, 0)),      # b3
        ],
        out_specs=pl.BlockSpec((tb, n_ch), lambda i: (i, 0)),
        compiler_params=pltpu.CompilerParams(
            dimension_semantics=("parallel",),              # megacore on v7x
            vmem_limit_bytes=32 * 1024 * 1024,              # safe on v5e/v6e/v7x
        ),
        cost_estimate=pl.CostEstimate(
            flops=flops, transcendentals=0, bytes_accessed=bytes_accessed),
    )(x16, w1, b1, w2, b2, w3, b3)

    return out[:B]


# ----------------------------------------------------------------------------
# Synthetic encoder / decoder stubs (plain JAX glue; deterministic weights).
# 1x1 convs are done as channels-last matmuls (rows = B*H*W, lanes = C).
# Encoder: n_sp x n_sp adaptive average pool + 1x1 conv in_ch -> mlp_ch + ReLU,
#          skips = input.
# Decoder: nearest-upsample + 1x1 conv mlp_ch -> in_ch, add skip.
# ----------------------------------------------------------------------------
def encoder_fn(x, enc_w_t, enc_b, n_sp):
    B, C, H, W = x.shape
    ph, pw = H // n_sp, W // n_sp
    pooled = x.reshape(B, C, n_sp, ph, n_sp, pw).mean(axis=(3, 5))      # (B,C,n_sp,n_sp)
    p = pooled.transpose(0, 2, 3, 1).reshape(-1, C)                     # (B*n_sp*n_sp, C)
    z = jnp.maximum(p @ enc_w_t + enc_b, 0.0)                           # (B*n_sp*n_sp, mlp_ch)
    z = z.reshape(B, n_sp, n_sp, -1).transpose(0, 3, 1, 2)              # NCHW bottleneck
    return z, x


def decoder_fn(z, skips, dec_w_t, dec_b):
    B, C, h, w = z.shape
    _, Cin, H, W = skips.shape
    up = jnp.repeat(jnp.repeat(z, H // h, axis=2), W // w, axis=3)      # nearest upsample
    u = up.transpose(0, 2, 3, 1).reshape(-1, C)                         # (B*H*W, C)
    y = u @ dec_w_t + dec_b                                             # (B*H*W, in_ch)
    y = y.reshape(B, H, W, Cin).transpose(0, 3, 1, 2)
    return y + skips


# ----------------------------------------------------------------------------
# Full module forward
# ----------------------------------------------------------------------------
def attention_module_forward(x, params, *, in_ch, mlp_ch, n_sp, use_pallas=True):
    assert x.shape[1] == in_ch
    z, skips = encoder_fn(x, params["enc_w"], params["enc_b"], n_sp)    # (B, mlp_ch, n_sp, n_sp)
    B = z.shape[0]
    z_flat = z.reshape(B, -1)                                           # Flatten (NCHW, C-major)
    if use_pallas:
        m = mlp_pallas(z_flat, params)                                  # Pallas MLP hot path
    else:
        m = mlp_reference(z_flat, params)                               # pure-JAX reference
    m = m.reshape(B, mlp_ch, n_sp, n_sp)                                # Resize((-1,mlp_ch,n_sp,n_sp))
    y = decoder_fn(m, skips, params["dec_w"], params["dec_b"])
    return y


def mlp_reference(x_flat, params):
    h = jnp.maximum(x_flat @ params["w1"] + params["b1"], 0.0)
    h = jnp.maximum(h @ params["w2"] + params["b2"], 0.0)
    return jnp.maximum(h @ params["w3"] + params["b3"], 0.0)


def init_params(key, in_ch, mlp_ch, n_sp):
    n_ch = mlp_ch * n_sp * n_sp
    ks = jax.random.split(key, 8)

    def lin(k, fan_in, fan_out):
        # torch.nn.Linear-style weight (out, in); transposed to (in, out) for the kernel.
        w = jax.random.normal(k, (fan_out, fan_in), jnp.float32) * (1.0 / jnp.sqrt(fan_in))
        return w.T

    params = {
        "w1": lin(ks[0], n_ch, 128), "b1": jnp.zeros((1, 128), jnp.float32),
        "w2": lin(ks[1], 128, 128),  "b2": jnp.zeros((1, 128), jnp.float32),
        "w3": lin(ks[2], 128, n_ch), "b3": jnp.zeros((1, n_ch), jnp.float32),
        # 1x1 conv weights stored channels-last-friendly: (in, out).
        "enc_w": jax.random.normal(ks[3], (in_ch, mlp_ch), jnp.float32) * 0.1,
        "enc_b": jnp.zeros((mlp_ch,), jnp.float32),
        "dec_w": jax.random.normal(ks[4], (mlp_ch, in_ch), jnp.float32) * 0.1,
        "dec_b": jnp.zeros((in_ch,), jnp.float32),
    }
    return params


if __name__ == "__main__":
    # Small, consistent shapes: B=2, in_ch=4, 16x16 input, mlp_ch=32, n_sp=4 -> n_ch=512.
    B, IN_CH, H, W = 2, 4, 16, 16
    MLP_CH, N_SP = 32, 4

    key = jax.random.PRNGKey(0)
    k_x, k_p = jax.random.split(key)
    x = jax.random.normal(k_x, (B, IN_CH, H, W), jnp.float32)
    params = init_params(k_p, IN_CH, MLP_CH, N_SP)

    fwd = jax.jit(
        lambda x, p: attention_module_forward(x, p, in_ch=IN_CH, mlp_ch=MLP_CH, n_sp=N_SP)
    )
    out = fwd(x, params)
    jax.block_until_ready(out)
    assert out.shape == (B, IN_CH, H, W), out.shape

    # Loose sanity check against a pure-f32 JAX reference (kernel uses bf16 inputs).
    ref = attention_module_forward(
        x, params, in_ch=IN_CH, mlp_ch=MLP_CH, n_sp=N_SP, use_pallas=False
    )
    jax.block_until_ready(ref)
    assert jnp.all(jnp.isfinite(out))
    assert jnp.allclose(out, ref, rtol=1e-1, atol=1e-2), float(jnp.abs(out - ref).max())

    print("KERNEL_OK")
</pallas_src>

<mosaic_0001>
module attributes {stable_mosaic.version = 11 : i64} {
  func.func @mlp_kernel(%arg0: i32, %arg1: memref<8x512xbf16, #tpu.memory_space<vmem>>, %arg2: memref<512x128xbf16, #tpu.memory_space<vmem>>, %arg3: memref<1x128xf32, #tpu.memory_space<vmem>>, %arg4: memref<128x128xbf16, #tpu.memory_space<vmem>>, %arg5: memref<1x128xf32, #tpu.memory_space<vmem>>, %arg6: memref<128x512xbf16, #tpu.memory_space<vmem>>, %arg7: memref<1x512xf32, #tpu.memory_space<vmem>>, %arg8: memref<8x512xf32, #tpu.memory_space<vmem>>) attributes {dimension_semantics = [#tpu.dimension_semantics<parallel>], iteration_bounds = array<i64: 1>, scalar_prefetch = 0 : i64, scratch_operands = 0 : i64, tpu.core_type = #tpu.core_type<tc>, window_params = [{transform_indices = @transform_0, window_bounds = array<i64: 8, 512>}, {pipeline_mode = #tpu.pipeline_mode<synchronous>, transform_indices = @transform_1, window_bounds = array<i64: 512, 128>}, {pipeline_mode = #tpu.pipeline_mode<synchronous>, transform_indices = @transform_2, window_bounds = array<i64: 1, 128>}, {pipeline_mode = #tpu.pipeline_mode<synchronous>, transform_indices = @transform_3, window_bounds = array<i64: 128, 128>}, {pipeline_mode = #tpu.pipeline_mode<synchronous>, transform_indices = @transform_4, window_bounds = array<i64: 1, 128>}, {pipeline_mode = #tpu.pipeline_mode<synchronous>, transform_indices = @transform_5, window_bounds = array<i64: 128, 512>}, {pipeline_mode = #tpu.pipeline_mode<synchronous>, transform_indices = @transform_6, window_bounds = array<i64: 1, 512>}, {transform_indices = @transform_7, window_bounds = array<i64: 8, 512>}]} {
    %c0 = arith.constant 0 : index
    %c0_0 = arith.constant 0 : index
    %0 = vector.load %arg1[%c0, %c0_0] : memref<8x512xbf16, #tpu.memory_space<vmem>>, vector<8x512xbf16>
    %c0_1 = arith.constant 0 : index
    %c0_2 = arith.constant 0 : index
    %1 = vector.load %arg2[%c0_1, %c0_2] : memref<512x128xbf16, #tpu.memory_space<vmem>>, vector<512x128xbf16>
    %cst = arith.constant dense<0.000000e+00> : vector<8x128xf32>
    %2 = tpu.matmul %0, %1, %cst {dimension_numbers = #tpu.dot_dimension_numbers<[1], [0], [0], [1], [0, 0, 1, 1], [], []>} : vector<8x512xbf16>, vector<512x128xbf16>, vector<8x128xf32> -> vector<8x128xf32>
    %c0_3 = arith.constant 0 : index
    %c0_4 = arith.constant 0 : index
    %3 = vector.load %arg3[%c0_3, %c0_4] : memref<1x128xf32, #tpu.memory_space<vmem>>, vector<1x128xf32>
    %4 = vector.broadcast %3 : vector<1x128xf32> to vector<8x128xf32>
    %5 = arith.addf %2, %4 : vector<8x128xf32>
    %cst_5 = arith.constant 0.000000e+00 : f32
    %6 = vector.broadcast %cst_5 : f32 to vector<8x128xf32>
    %7 = arith.maximumf %5, %6 : vector<8x128xf32>
    %8 = arith.truncf %7 : vector<8x128xf32> to vector<8x128xbf16>
    %c0_6 = arith.constant 0 : index
    %c0_7 = arith.constant 0 : index
    %9 = vector.load %arg4[%c0_6, %c0_7] : memref<128x128xbf16, #tpu.memory_space<vmem>>, vector<128x128xbf16>
    %cst_8 = arith.constant dense<0.000000e+00> : vector<8x128xf32>
    %10 = tpu.matmul %8, %9, %cst_8 {dimension_numbers = #tpu.dot_dimension_numbers<[1], [0], [0], [1], [0, 0, 1, 1], [], []>} : vector<8x128xbf16>, vector<128x128xbf16>, vector<8x128xf32> -> vector<8x128xf32>
    %c0_9 = arith.constant 0 : index
    %c0_10 = arith.constant 0 : index
    %11 = vector.load %arg5[%c0_9, %c0_10] : memref<1x128xf32, #tpu.memory_space<vmem>>, vector<1x128xf32>
    %12 = vector.broadcast %11 : vector<1x128xf32> to vector<8x128xf32>
    %13 = arith.addf %10, %12 : vector<8x128xf32>
    %cst_11 = arith.constant 0.000000e+00 : f32
    %14 = vector.broadcast %cst_11 : f32 to vector<8x128xf32>
    %15 = arith.maximumf %13, %14 : vector<8x128xf32>
    %16 = arith.truncf %15 : vector<8x128xf32> to vector<8x128xbf16>
    %c0_12 = arith.constant 0 : index
    %c0_13 = arith.constant 0 : index
    %17 = vector.load %arg6[%c0_12, %c0_13] : memref<128x512xbf16, #tpu.memory_space<vmem>>, vector<128x512xbf16>
    %cst_14 = arith.constant dense<0.000000e+00> : vector<8x512xf32>
    %18 = tpu.matmul %16, %17, %cst_14 {dimension_numbers = #tpu.dot_dimension_numbers<[1], [0], [0], [1], [0, 0, 1, 1], [], []>} : vector<8x128xbf16>, vector<128x512xbf16>, vector<8x512xf32> -> vector<8x512xf32>
    %c0_15 = arith.constant 0 : index
    %c0_16 = arith.constant 0 : index
    %19 = vector.load %arg7[%c0_15, %c0_16] : memref<1x512xf32, #tpu.memory_space<vmem>>, vector<1x512xf32>
    %20 = vector.broadcast %19 : vector<1x512xf32> to vector<8x512xf32>
    %21 = arith.addf %18, %20 : vector<8x512xf32>
    %cst_17 = arith.constant 0.000000e+00 : f32
    %22 = vector.broadcast %cst_17 : f32 to vector<8x512xf32>
    %23 = arith.maximumf %21, %22 : vector<8x512xf32>
    %c0_18 = arith.constant 0 : index
    %c0_19 = arith.constant 0 : index
    %24 = vector.load %arg8[%c0_18, %c0_19] : memref<8x512xf32, #tpu.memory_space<vmem>>, vector<8x512xf32>
    tpu.vector_store %arg8[%c0_18, %c0_19], %23 {strides = array<i32>} : memref<8x512xf32, #tpu.memory_space<vmem>>, vector<8x512xf32>,
    return
  }
  func.func @transform_0(%arg0: i32) -> (i32, i32) {
    %c0_i32 = arith.constant 0 : i32
    %c0_i32_0 = arith.constant 0 : i32
    return %arg0, %c0_i32 : i32, i32
  }
  func.func @transform_1(%arg0: i32) -> (i32, i32) {
    %c0_i32 = arith.constant 0 : i32
    %c0_i32_0 = arith.constant 0 : i32
    %c0_i32_1 = arith.constant 0 : i32
    return %c0_i32, %c0_i32_0 : i32, i32
  }
  func.func @transform_2(%arg0: i32) -> (i32, i32) {
    %c0_i32 = arith.constant 0 : i32
    %c0_i32_0 = arith.constant 0 : i32
    %c0_i32_1 = arith.constant 0 : i32
    return %c0_i32, %c0_i32_0 : i32, i32
  }
  func.func @transform_3(%arg0: i32) -> (i32, i32) {
    %c0_i32 = arith.constant 0 : i32
    %c0_i32_0 = arith.constant 0 : i32
    %c0_i32_1 = arith.constant 0 : i32
    return %c0_i32, %c0_i32_0 : i32, i32
  }
  func.func @transform_4(%arg0: i32) -> (i32, i32) {
    %c0_i32 = arith.constant 0 : i32
    %c0_i32_0 = arith.constant 0 : i32
    %c0_i32_1 = arith.constant 0 : i32
    return %c0_i32, %c0_i32_0 : i32, i32
  }
  func.func @transform_5(%arg0: i32) -> (i32, i32) {
    %c0_i32 = arith.constant 0 : i32
    %c0_i32_0 = arith.constant 0 : i32
    %c0_i32_1 = arith.constant 0 : i32
    return %c0_i32, %c0_i32_0 : i32, i32
  }
  func.func @transform_6(%arg0: i32) -> (i32, i32) {
    %c0_i32 = arith.constant 0 : i32
    %c0_i32_0 = arith.constant 0 : i32
    %c0_i32_1 = arith.constant 0 : i32
    return %c0_i32, %c0_i32_0 : i32, i32
  }
  func.func @transform_7(%arg0: i32) -> (i32, i32) {
    %c0_i32 = arith.constant 0 : i32
    %c0_i32_0 = arith.constant 0 : i32
    return %arg0, %c0_i32 : i32, i32
  }
}

</mosaic_0001>

<bundles_post_ra>
// kernel: _lambda_.1
= control target key start
LH: loop header
LB: loop body
LE: loop exit
PB: predicated region body
PF: predicated region fallthrough
CT: control target
= control target key end

     0   :  { %v1055_v39 = vmov 0.0   ;;  %vm1056_vm0 = vmmov 0   ;;  %s1341_s1 = inlined_call_operand.vmem [shape: bf16[512,128], index: 1, kind: input, shape index: {}]   ;;  %s1342_s0 = inlined_call_operand.vmem [shape: bf16[8,512], index: 0, kind: input, shape index: {}]   ;;  %s1343_s3 = inlined_call_operand.vmem [shape: bf16[128,128], index: 3, kind: input, shape index: {}]   ;;  %s1344_s5 = inlined_call_operand.vmem [shape: bf16[128,512], index: 5, kind: input, shape index: {}]   ;;  %s1345_s2 = inlined_call_operand.vmem [shape: f32[1,128], index: 2, kind: input, shape index: {}]   ;;  %s1346_s4 = inlined_call_operand.vmem [shape: f32[1,128], index: 4, kind: input, shape index: {}]   ;;  %s1347_s6 = inlined_call_operand.vmem [shape: f32[1,512], index: 6, kind: input, shape index: {}]   ;;  %s1348_s7 = inlined_call_operand.vmem [shape: f32[8,512], index: 7, kind: output, shape index: {}]  }
   0x1   :  { %v963_v0 = vld [vmem:[%s1341_s1 + $0x78] sm:$0xff]   ;;  %v967_v4 = vld [vmem:[%s1341_s1 + $0x70] sm:$0xff]   ;;  %v971_v8 = vld [vmem:[%s1341_s1 + $0x68] sm:$0xff]  }
   0x2   :  { %v964_v1 = vld [vmem:[%s1341_s1 + $0xf8] sm:$0xff]   ;;  %887 = vmatprep.subr.bf16.mxu0 %v963_v0  ;;  %v968_v5 = vld [vmem:[%s1341_s1 + $0xf0] sm:$0xff]   ;;  %v972_v9 = vld [vmem:[%s1341_s1 + $0xe8] sm:$0xff]  }
   0x3   :  { %v965_v2 = vld [vmem:[%s1341_s1 + $0x38] sm:$0xff]   ;;  %909 = vmatprep.subr.bf16.mxu1 %v964_v1  ;;  %v969_v6 = vld [vmem:[%s1341_s1 + $0x30] sm:$0xff]   ;;  %v973_v10 = vld [vmem:[%s1341_s1 + $0x28] sm:$0xff]  }
   0x4   :  { %v966_v3 = vld [vmem:[%s1341_s1 + $0xb8] sm:$0xff]   ;;  %888 = vmatpush3.bf16.msra.mxu0 %v965_v2  ;;  %v970_v7 = vld [vmem:[%s1341_s1 + $0xb0] sm:$0xff]   ;;  %v974_v11 = vld [vmem:[%s1341_s1 + $0xa8] sm:$0xff]  }
   0x5   :  { %910 = vmatpush3.bf16.msra.mxu1 %v966_v3  ;;  %889 = vmatprep.subr.bf16.mxu0 %v967_v4  ;;  %v975_v12 = vld [vmem:[%s1341_s1 + $0x60] sm:$0xff]   ;;  %v979_v16 = vld [vmem:[%s1341_s1 + $0x58] sm:$0xff]   ;;  %v983_v20 = vld [vmem:[%s1341_s1 + $0x50] sm:$0xff]  }
   0x6   :  { %911 = vmatprep.subr.bf16.mxu1 %v968_v5  ;;  %v976_v13 = vld [vmem:[%s1341_s1 + $0xe0] sm:$0xff]   ;;  %v980_v17 = vld [vmem:[%s1341_s1 + $0xd8] sm:$0xff]   ;;  %v984_v21 = vld [vmem:[%s1341_s1 + $0xd0] sm:$0xff]  }
   0x7   :  { %v977_v14 = vld [vmem:[%s1341_s1 + $0x20] sm:$0xff]   ;;  %v981_v18 = vld [vmem:[%s1341_s1 + $0x18] sm:$0xff]   ;;  %v985_v22 = vld [vmem:[%s1341_s1 + $0x10] sm:$0xff]  }
   0x8   :  { %890 = vmatpush3.bf16.msra.mxu0 %v969_v6  ;;  %v978_v15 = vld [vmem:[%s1341_s1 + $0xa0] sm:$0xff]   ;;  %v982_v19 = vld [vmem:[%s1341_s1 + $0x98] sm:$0xff]   ;;  %v986_v23 = vld [vmem:[%s1341_s1 + $0x90] sm:$0xff]  }
   0x9   :  { %912 = vmatpush3.bf16.msra.mxu1 %v970_v7  ;;  %891 = vmatprep.subr.bf16.mxu0 %v971_v8  ;;  %v987_v24 = vld [vmem:[%s1341_s1 + $0x48] sm:$0xff]   ;;  %v991_v28 = vld [vmem:[%s1341_s1 + $0x40] sm:$0xff]   ;;  %v999_v38 = vld [vmem:[%s1343_s3 + $0x38] sm:$0xff]  }
   0xa   :  { %913 = vmatprep.subr.bf16.mxu1 %v972_v9  ;;  %v988_v25 = vld [vmem:[%s1341_s1 + $0xc8] sm:$0xff]   ;;  %v992_v29 = vld [vmem:[%s1341_s1 + $0xc0] sm:$0xff]   ;;  %v1000_v40 = vld [vmem:[%s1343_s3 + $0x30] sm:$0xff]  }
   0xb   :  { %v989_v26 = vld [vmem:[%s1341_s1 + $0x8] sm:$0xff]   ;;  %v993_v30 = vld [vmem:[%s1341_s1] sm:$0xff]   ;;  %v1003_v43 = vld [vmem:[%s1343_s3 + $0x18] sm:$0xff]  }
   0xc   :  { %892 = vmatpush3.bf16.msra.mxu0 %v973_v10  ;;  %v990_v27 = vld [vmem:[%s1341_s1 + $0x88] sm:$0xff]   ;;  %v994_v31 = vld [vmem:[%s1341_s1 + $0x80] sm:$0xff]   ;;  %v1004_v44 = vld [vmem:[%s1343_s3 + $0x10] sm:$0xff]  }
   0xd   :  { %914 = vmatpush3.bf16.msra.mxu1 %v974_v11  ;;  %893 = vmatprep.subr.bf16.mxu0 %v975_v12  ;;  %v27_v32 = vld [vmem:[%s1342_s0] sm:$0xff]  ;;  %v28_v33 = vld [vmem:[%s1342_s0 + $0x8] sm:$0xff] }
   0xe   :  { %915 = vmatprep.subr.bf16.mxu1 %v976_v13  ;;  %v810_v34 = vcombine.low %v27_v32, %v27_v32  ;;  %v811_v35 = vcombine.high %v27_v32, %v27_v32  ;;  %v812_v36 = vcombine.low %v28_v33, %v28_v33  ;;  %v813_v37 = vcombine.high %v28_v33, %v28_v33  ;;  %v1001_v41 = vld [vmem:[%s1343_s3 + $0x28] sm:$0xff]   ;;  %v1002_v42 = vld [vmem:[%s1343_s3 + $0x20] sm:$0xff]  }
   0xf   :  { %v1005_v45 = vld [vmem:[%s1343_s3 + $0x8] sm:$0xff]   ;;  %v1006_v46 = vld [vmem:[%s1343_s3] sm:$0xff]  }
  0x10   :  { %894 = vmatpush3.bf16.msra.mxu0 %v977_v14  ;;  %338 = vmatprep.mubr.bf16.mxu0 %v811_v35  ;;  %v1007_v47 = vld [vmem:[%s1344_s5 + $0xe0] ss:$16 sps:$4 sm:$0xff]   ;;  %v1009_v48 = vld [vmem:[%s1344_s5 + $0xe4] ss:$16 sps:$4 sm:$0xff]   ;;  %v1012_v49 = vld [vmem:[%s1344_s5 + $0xec] ss:$16 sps:$4 sm:$0xff]  }
  0x11   :  { %916 = vmatpush3.bf16.msra.mxu1 %v978_v15  ;;  %895 = vmatprep.subr.bf16.mxu0 %v979_v16  ;;  %v1015_v50 = vld [vmem:[%s1344_s5 + $0xc4] ss:$16 sps:$4 sm:$0xff]   ;;  %v1013_v51 = vld [vmem:[%s1344_s5 + $0xc0] ss:$16 sps:$4 sm:$0xff]   ;;  %v1010_v12 = vld [vmem:[%s1344_s5 + $0xe8] ss:$16 sps:$4 sm:$0xff]  }
  0x12   :  { %917 = vmatprep.subr.bf16.mxu1 %v980_v17  ;;  %378 = vmatprep.mubr.bf16.mxu1 %v813_v37  ;;  %v1021_v52 = vld [vmem:[%s1344_s5 + $0xa4] ss:$16 sps:$4 sm:$0xff]   ;;  %v1019_v53 = vld [vmem:[%s1344_s5 + $0xa0] ss:$16 sps:$4 sm:$0xff]   ;;  %v1018_v14 = vld [vmem:[%s1344_s5 + $0xcc] ss:$16 sps:$4 sm:$0xff]  }
  0x13   :  { %v1027_v54 = vld [vmem:[%s1344_s5 + $0x84] ss:$16 sps:$4 sm:$0xff]   ;;  %v1025_v55 = vld [vmem:[%s1344_s5 + $0x80] ss:$16 sps:$4 sm:$0xff]   ;;  %v1016_v15 = vld [vmem:[%s1344_s5 + $0xc8] ss:$16 sps:$4 sm:$0xff]  }
  0x14   :  { %896 = vmatpush3.bf16.msra.mxu0 %v981_v18  ;;  %v1033_v56 = vld [vmem:[%s1344_s5 + $0x64] ss:$16 sps:$4 sm:$0xff]   ;;  %v1031_v57 = vld [vmem:[%s1344_s5 + $0x60] ss:$16 sps:$4 sm:$0xff]   ;;  %v1024_v16 = vld [vmem:[%s1344_s5 + $0xac] ss:$16 sps:$4 sm:$0xff]  }
  0x15   :  { %918 = vmatpush3.bf16.msra.mxu1 %v982_v19  ;;  %897 = vmatprep.subr.bf16.mxu0 %v983_v20  ;;  %v1039_v58 = vld [vmem:[%s1344_s5 + $0x44] ss:$16 sps:$4 sm:$0xff]   ;;  %v1037_v59 = vld [vmem:[%s1344_s5 + $0x40] ss:$16 sps:$4 sm:$0xff]   ;;  %v1022_v17 = vld [vmem:[%s1344_s5 + $0xa8] ss:$16 sps:$4 sm:$0xff]  }
  0x16   :  { %919 = vmatprep.subr.bf16.mxu1 %v984_v21  ;;  %v1045_v60 = vld [vmem:[%s1344_s5 + $0x24] ss:$16 sps:$4 sm:$0xff]   ;;  %v1043_v61 = vld [vmem:[%s1344_s5 + $0x20] ss:$16 sps:$4 sm:$0xff]   ;;  %v1030_v18 = vld [vmem:[%s1344_s5 + $0x8c] ss:$16 sps:$4 sm:$0xff]  }
  0x17   :  { %v809_v0 = vld [vmem:[%s1345_s2] ss:$0 sm:$0xff]  ;;  %v1028_v19 = vld [vmem:[%s1344_s5 + $0x88] ss:$16 sps:$4 sm:$0xff]   ;;  %v1036_v20 = vld [vmem:[%s1344_s5 + $0x6c] ss:$16 sps:$4 sm:$0xff]  }
  0x18   :  { %898 = vmatpush3.bf16.msra.mxu0 %v985_v22  ;;  %v1034_v21 = vld [vmem:[%s1344_s5 + $0x68] ss:$16 sps:$4 sm:$0xff]   ;;  %v1042_v22 = vld [vmem:[%s1344_s5 + $0x4c] ss:$16 sps:$4 sm:$0xff]  }
  0x19   :  { %920 = vmatpush3.bf16.msra.mxu1 %v986_v23  ;;  %899 = vmatprep.subr.bf16.mxu0 %v987_v24  ;;  %v1040_v23 = vld [vmem:[%s1344_s5 + $0x48] ss:$16 sps:$4 sm:$0xff]   ;;  %v1048_v24 = vld [vmem:[%s1344_s5 + $0x2c] ss:$16 sps:$4 sm:$0xff]  }
  0x1a   :  { %921 = vmatprep.subr.bf16.mxu1 %v988_v25  ;;  %v1046_v25 = vld [vmem:[%s1344_s5 + $0x28] ss:$16 sps:$4 sm:$0xff]  }
  0x1c   :  { %900 = vmatpush3.bf16.msra.mxu0 %v989_v26  ;;  %v1051_v26 = vld [vmem:[%s1344_s5 + $0x4] ss:$16 sps:$4 sm:$0xff]  }
  0x1d   :  { %922 = vmatpush3.bf16.msra.mxu1 %v990_v27  ;;  %901 = vmatprep.subr.bf16.mxu0 %v991_v28  ;;  %v1054_v27 = vld [vmem:[%s1344_s5 + $0xc] ss:$16 sps:$4 sm:$0xff]   ;;  %v1049_v28 = vld [vmem:[%s1344_s5] ss:$16 sps:$4 sm:$0xff]  }
  0x1e   :  { %923 = vmatprep.subr.bf16.mxu1 %v992_v29  ;;  %v1052_v29 = vld [vmem:[%s1344_s5 + $0x8] ss:$16 sps:$4 sm:$0xff]  }
  0x20   :  { %902 = vmatpush3.bf16.msra.mxu0 %v993_v30  ;;  %v1057_v30 = vmov 0  }
  0x21   :  { %924 = vmatpush3.bf16.msra.mxu1 %v994_v31  ;;  %940 = vmatprep.subr.bf16.mxu0 %v1055_v39  ;;  %v846_v31 = vld [vmem:[%s1346_s4] ss:$0 sm:$0xff] }
  0x22   :  { %715 = vmatprep.subr.bf16.mxu1 %v1009_v48 }
  0x23   :  { %339 = vmatmul.mubr.bf16.vlgmr.msra.gmra.mxu0 %v810_v34 }
  0x24   :  { %379 = vmatmul.mubr.bf16.vlgmr.msra.gmra.mxu1 %v812_v36  ;;  %941 = vmatpush3.bf16.msra.mxu0 %v999_v38 }
  0x25   :  { %942 = vmatprep.subr.bf16.mxu0 %v1055_v39  ;;  %956 = vmatprep.mubr.msk.bf16.mxu0 %vm1056_vm0, %v1055_v39 }
  0x26   :  { %716 = vmatpush1.bf16.msra.mxu1 %v1007_v47  ;;  %747 = vmatprep.mubr.bf16.mxu1 %v1057_v30 }
  0x27   :  { %717 = vmatprep.subr.bf16.mxu1 %v1015_v50 }
  0x28   :  { %943 = vmatpush3.bf16.msra.mxu0 %v1000_v40 }
  0x29   :  { %944 = vmatprep.subr.bf16.mxu0 %v1055_v39 }
  0x2a   :  { %718 = vmatpush1.bf16.msra.mxu1 %v1013_v51 }
  0x2b   :  { %719 = vmatprep.subr.bf16.mxu1 %v1021_v52 }
  0x2c   :  { %945 = vmatpush3.bf16.msra.mxu0 %v1001_v41 }
  0x2d   :  { %946 = vmatprep.subr.bf16.mxu0 %v1055_v39 }
  0x2e   :  { %720 = vmatpush1.bf16.msra.mxu1 %v1019_v53 }
  0x2f   :  { %721 = vmatprep.subr.bf16.mxu1 %v1027_v54 }
  0x30   :  { %947 = vmatpush3.bf16.msra.mxu0 %v1002_v42 }
  0x31   :  { %948 = vmatprep.subr.bf16.mxu0 %v1055_v39 }
  0x32   :  { %722 = vmatpush1.bf16.msra.mxu1 %v1025_v55 }
  0x33   :  { %723 = vmatprep.subr.bf16.mxu1 %v1033_v56 }
  0x34   :  { %949 = vmatpush3.bf16.msra.mxu0 %v1003_v43  ;;  %v533_v43 = vld [vmem:[%s1347_s6] sm:$0xf] }
  0x35   :  { %950 = vmatprep.subr.bf16.mxu0 %v1055_v39 }
  0x36   :  { %724 = vmatpush1.bf16.msra.mxu1 %v1031_v57 }
  0x37   :  { %725 = vmatprep.subr.bf16.mxu1 %v1039_v58 }
  0x38   :  { %951 = vmatpush3.bf16.msra.mxu0 %v1004_v44 }
  0x39   :  { %952 = vmatprep.subr.bf16.mxu0 %v1055_v39 }
  0x3a   :  { %726 = vmatpush1.bf16.msra.mxu1 %v1037_v59 }
  0x3b   :  { %727 = vmatprep.subr.bf16.mxu1 %v1045_v60 }
  0x3c   :  { %953 = vmatpush3.bf16.msra.mxu0 %v1005_v45 }
  0x3d   :  { %954 = vmatprep.subr.bf16.mxu0 %v1055_v39  ;;  %v535_v39 = vlaneseq }
  0x3e   :  { %728 = vmatpush1.bf16.msra.mxu1 %v1043_v61 }
  0x3f   :  { %729 = vmatprep.subr.bf16.mxu1 %v1051_v26  ;;  %v536_v40 = vshrl.u32 %v535_v39, 7 }
  0x40   :  { %955 = vmatpush3.bf16.msra.mxu0 %v1006_v46 }
  0x41   :  { %756 = vmatprep.subr.bf16.mxu0 %v1012_v49  ;;  %v537_v41 = vsub.s32 0, %v536_v40  ;;  %v545_v42 = vsub.s32 2, %v536_v40  ;;  %v541_v44 = vsub.s32 1, %v536_v40  ;;  %v549_v45 = vsub.s32 3, %v536_v40 }
  0x42   :  { %730 = vmatpush1.bf16.msra.mxu1 %v1049_v28 }
  0x43   :  { %v538_v46 = vrot.slane %v533_v43, %v537_v41  ;;  %v546_v47 = vrot.slane %v533_v43, %v545_v42  ;;  %v542_v48 = vrot.slane %v533_v43, %v541_v44  ;;  %v550_v49 = vrot.slane %v533_v43, %v549_v45 }
  0xe3   :  { %v903_v62 = vpop.f32.mrf.mxu0 }
  0xe4   :  { %v925_v63 = vpop.f32.mrf.mxu1 }
  0xe5   :  { %v904_v1 = vpop.f32.mrf.mxu0 }
  0xe6   :  { %v926_v2 = vpop.f32.mrf.mxu1  ;;  %v905_v3 = vadd.f32 %v904_v1, %v903_v62 }
  0xe7   :  { %v906_v4 = vpop.f32.mrf.mxu0  ;;  %v927_v7 = vadd.f32 %v926_v2, %v925_v63 }
  0xe8   :  { %v928_v5 = vpop.f32.mrf.mxu1  ;;  %v341_v6 = vadd.f32 %v905_v3, %v809_v0 }
  0xe9   :  { %v907_v8 = vpop.f32.mrf.mxu0 }
  0xea   :  { %v929_v9 = vpop.f32.mrf.mxu1  ;;  %v381_v10 = vadd.f32 %v927_v7, %v341_v6 }
  0xec   :  { %v386_v11 = vmax.f32 %v381_v10, 0.0 }
  0xee   :  { %v387_v13 = vpack.c.bf16 %v386_v11, %v386_v11 }
  0xf0   :  { %957 = vmatmul.mubr.bf16.vlgmr.msra.gmra.mxu0 %v387_v13 }
  0xf1   :  { %757 = vmatpush1.bf16.msra.mxu0 %v1010_v12  ;;  %788 = vmatprep.mubr.bf16.mxu0 %v1057_v30 }
  0xf2   :  { %758 = vmatprep.subr.bf16.mxu0 %v1018_v14 }
  0xf5   :  { %759 = vmatpush1.bf16.msra.mxu0 %v1016_v15 }
  0xf6   :  { %760 = vmatprep.subr.bf16.mxu0 %v1024_v16 }
  0xf9   :  { %761 = vmatpush1.bf16.msra.mxu0 %v1022_v17 }
  0xfa   :  { %762 = vmatprep.subr.bf16.mxu0 %v1030_v18 }
  0xfd   :  { %763 = vmatpush1.bf16.msra.mxu0 %v1028_v19 }
  0xfe   :  { %764 = vmatprep.subr.bf16.mxu0 %v1036_v20 }
 0x101   :  { %765 = vmatpush1.bf16.msra.mxu0 %v1034_v21 }
 0x102   :  { %766 = vmatprep.subr.bf16.mxu0 %v1042_v22 }
 0x105   :  { %767 = vmatpush1.bf16.msra.mxu0 %v1040_v23 }
 0x106   :  { %768 = vmatprep.subr.bf16.mxu0 %v1048_v24 }
 0x109   :  { %769 = vmatpush1.bf16.msra.mxu0 %v1046_v25 }
 0x10a   :  { %770 = vmatprep.subr.bf16.mxu0 %v1054_v27 }
 0x10d   :  { %771 = vmatpush1.bf16.msra.mxu0 %v1052_v29 }
 0x1b0   :  { %v493_v32 = vpop.f32.mrf.mxu0 }
 0x1b1   :  { %v494_v33 = vadd.f32 %v846_v31, %v493_v32 }
 0x1b2   :  { %v958_v34 = vpop.f32.mrf.mxu0 }
 0x1b3   :  { %v499_v35 = vmax.f32 %v494_v33, 0.0 }
 0x1b4   :  { %v496_v36 = vpop.f32.mrf.mxu0 }
 0x1b5   :  { %v500_v37 = vpack.c.bf16 %v499_v35, %v499_v35 }
 0x1b6   :  { %v959_v38 = vpop.f32.mrf.mxu0 }
 0x1b7   :  { %748 = vmatmul.mubr.bf16.vlgmr.msra.gmra.mxu1 %v500_v37  ;;  %789 = vmatmul.mubr.bf16.vlgmr.msra.gmra.mxu0 %v500_v37 }
 0x277   :  { %v749_v50 = vpop.f32.mrf.mxu1  ;;  %v790_v51 = vpop.f32.mrf.mxu0 }
 0x278   :  { %v750_v52 = vadd.f32 %v749_v50, %v538_v46  ;;  %v791_v53 = vadd.f32 %v790_v51, %v546_v47 }
 0x279   :  { %v751_v54 = vpop.f32.mrf.mxu1  ;;  %v792_v55 = vpop.f32.mrf.mxu0 }
 0x27a   :  { %v797_v56 = vmax.f32 %v750_v52, 0.0  ;;  %v799_v57 = vmax.f32 %v791_v53, 0.0  ;;  %v752_v58 = vadd.f32 %v751_v54, %v542_v48  ;;  %v793_v59 = vadd.f32 %v792_v55, %v550_v49 }
 0x27b   :  { %v753_v60 = vpop.f32.mrf.mxu1  ;;  %v794_v61 = vpop.f32.mrf.mxu0 }
 0x27c   :  { %801 = vst [vmem:[%s1348_s7] sm:$0xff] %v797_v56  ;;  %803 = vst [vmem:[%s1348_s7 + $0x10] sm:$0xff] %v799_v57  ;;  %v798_v62 = vmax.f32 %v752_v58, 0.0  ;;  %v800_v63 = vmax.f32 %v793_v59, 0.0 }
 0x27d   :  { %v754_v0 = vpop.f32.mrf.mxu1  ;;  %v795_v1 = vpop.f32.mrf.mxu0 }
 0x27e   :  { %802 = vst [vmem:[%s1348_s7 + $0x8] sm:$0xff] %v798_v62  ;;  %804 = vst [vmem:[%s1348_s7 + $0x18] sm:$0xff] %v800_v63 }

</bundles_post_ra>
